<compile_context>
chip_gen: v7x
topology: tpu7x:2x2x1
jax: 0.10.0
libtpu: 0.0.40
codegen_flags: <defaults>
</compile_context>

<pallas_src>
import functools

import numpy as np
import jax
import jax.numpy as jnp
from jax import lax
from jax.experimental import pallas as pl
from jax.experimental.pallas import tpu as pltpu


def _penc_kernel(const_ref, o_ref, *, r_scale):
    """Compute one (TX, W) lane-dense tile of the positional encoding.

    const_ref : (3, W) f32
        row 0: lane // C            (position offset of each lane inside a packed row)
        row 1: inv_freq per lane    (inv_freq[(lane % C) // 2])
        row 2: cos phase per lane   (0 for even channels, pi/2 for odd)
    o_ref     : (TX, W) output tile; packed row `r`, lane `j` holds
                emb[r * R + j // C, j % C].
    """
    tx, w = o_ref.shape
    row0 = (pl.program_id(0) * tx).astype(jnp.float32)
    rows = row0 + lax.broadcasted_iota(jnp.int32, (tx, w), 0).astype(jnp.float32)
    # Exact integer positions in f32 (rows * R + lane//C), matching the reference.
    pos = rows * r_scale + const_ref[0:1, :]
    # cos(a) == sin(a + pi/2): one EUP sin per element, no select mask.
    angle = pos * const_ref[1:2, :] + const_ref[2:3, :]
    o_ref[...] = jnp.sin(angle).astype(o_ref.dtype)


def _sublane_multiple(dtype):
    """Second-minor block-dim granularity for the output dtype."""
    itemsize = jnp.dtype(dtype).itemsize
    if itemsize == 2:
        return 16          # bf16 / f16 pack 2 per sublane word
    if itemsize == 1:
        return 32          # int8 / fp8
    return 8               # f32 and wider


def _choose_tile_rows(xp, padded_lane_width, itemsize, sublane):
    """Packed-row tile: sized in (lane-padded) bytes, >=2 grid steps if possible."""
    target_bytes = 2 * 1024 * 1024   # ~2 MiB output block: >=85% of HBM roofline
    max_bytes = 8 * 1024 * 1024      # 2x double-buffered block << 32 MiB scoped VMEM (v7x)
    row_bytes = max(padded_lane_width * itemsize, 1)
    tx = max(int(target_bytes // row_bytes), 1)
    tx = min(tx, max(int(max_bytes // row_bytes), 1))
    # Keep at least 2 grid steps when possible so both v7x TensorCores get work.
    if xp >= 2 * sublane:
        half_rows = (xp + 1) // 2
        half = ((half_rows + sublane - 1) // sublane) * sublane
        tx = min(tx, half)
    if tx >= xp:
        return xp                     # full extent: no divisibility requirement
    return max((tx // sublane) * sublane, sublane)


def positional_encoding_1d(tensor):
    """Pallas equivalent of PositionalEncoding1D(channels=C)(tensor).

    tensor: (batch, x, ch) array; only its shape/dtype are used.
    returns: (batch, x, ch) positional encoding of the same dtype.
    """
    if tensor.ndim != 3:
        raise RuntimeError("The input tensor has to be 3d!")
    batch, x, orig_ch = tensor.shape
    c = int(orig_ch)
    channels = int(np.ceil(c / 2) * 2)   # even channel count used for inv_freq
    out_dtype = tensor.dtype
    itemsize = jnp.dtype(out_dtype).itemsize
    sublane = _sublane_multiple(out_dtype)

    # Lane-dense packing factor: R final rows per kernel row so R*C % 128 == 0.
    if c % 128 == 0:
        r_pack = 1
    else:
        r_pack = 128 // int(np.gcd(c, 128))
        if r_pack * c > 32768:          # guard against absurdly wide packed rows
            r_pack = 1
    w = r_pack * c

    # Host-precomputed per-lane constants, merged into a single (3, W) operand.
    inv_freq_pair = 1.0 / np.power(
        10000.0, np.arange(0, channels, 2, dtype=np.float32) / np.float32(channels))
    lane = np.arange(w)
    ch_idx = lane % c
    lane_pos = (lane // c).astype(np.float32)                    # position offset in packed row
    inv_f = inv_freq_pair[ch_idx // 2].astype(np.float32)        # inv_freq per lane
    phase = np.where(ch_idx % 2 == 1, np.pi / 2.0, 0.0).astype(np.float32)
    const = jnp.asarray(np.stack([lane_pos, inv_f, phase], axis=0), dtype=jnp.float32)

    # Packed-row extent, tile, and padding so every grid block is full.
    xp = -(-x // r_pack)                                   # packed rows needed
    padded_w = ((w + 127) // 128) * 128                    # lane-padded width for byte math
    tx = _choose_tile_rows(xp, padded_w, itemsize, sublane)
    xp_pad = -(-xp // tx) * tx                             # pad so grid divides evenly
    grid = (xp_pad // tx,)

    kernel = functools.partial(_penc_kernel, r_scale=float(r_pack))

    emb_packed = pl.pallas_call(
        kernel,
        out_shape=jax.ShapeDtypeStruct((xp_pad, w), out_dtype),
        grid=grid,
        in_specs=[pl.BlockSpec((3, w), lambda i: (0, 0))],
        out_specs=pl.BlockSpec((tx, w), lambda i: (i, 0)),
        compiler_params=pltpu.CompilerParams(
            dimension_semantics=("parallel",),     # shard tiles over v7x's 2 TCs
            vmem_limit_bytes=32 * 1024 * 1024,
        ),
    )(const)

    # Free contiguous reshape back to (x, C), then a lazy broadcast over batch.
    emb = emb_packed.reshape(xp_pad * r_pack, c)[:x]
    return jnp.broadcast_to(emb[None, :, :], (batch, x, orig_ch))


def _reference(tensor, internal_dtype=np.float32):
    """Pure-numpy reference mirroring the PyTorch forward."""
    batch, x, orig_ch = tensor.shape
    channels = int(np.ceil(orig_ch / 2) * 2)
    inv_freq = 1.0 / np.power(
        10000.0, np.arange(0, channels, 2, dtype=internal_dtype) / internal_dtype(channels))
    pos = np.arange(x, dtype=internal_dtype)
    sin_inp = np.einsum("i,j->ij", pos, inv_freq)
    emb = np.stack((np.sin(sin_inp), np.cos(sin_inp)), axis=-1)
    emb = emb.reshape(x, channels)
    out = np.broadcast_to(emb[None, :, :orig_ch], (batch, x, orig_ch))
    return np.asarray(out, dtype=np.float32)


if __name__ == "__main__":
    key = jax.random.PRNGKey(0)

    # 1) Primary test: shapes implied by the module (batch=2, x=16, ch=4).
    t1 = jax.random.normal(key, (2, 16, 4), dtype=jnp.float32)
    o1 = jax.block_until_ready(positional_encoding_1d(t1))
    assert o1.shape == t1.shape and o1.dtype == t1.dtype
    np.testing.assert_allclose(np.asarray(o1, dtype=np.float32), _reference(t1),
                               rtol=1e-5, atol=1e-4)

    # 2) Odd channel count (exercises the ceil(C/2)*2 / truncation path).
    t2 = jax.random.normal(key, (3, 24, 5), dtype=jnp.float32)
    o2 = jax.block_until_ready(positional_encoding_1d(t2))
    np.testing.assert_allclose(np.asarray(o2, dtype=np.float32), _reference(t2),
                               rtol=1e-5, atol=1e-4)

    # 3) Multi-tile grid + padded packed rows (x not a multiple of R * tile).
    t3 = jax.random.normal(key, (2, 300, 64), dtype=jnp.float32)
    o3 = jax.block_until_ready(positional_encoding_1d(t3))
    np.testing.assert_allclose(np.asarray(o3, dtype=np.float32),
                               _reference(t3, np.float64),
                               rtol=1e-4, atol=1e-3)

    # 4) bf16 output (exercises the 16-row sublane rounding path).
    t4 = jax.random.normal(key, (2, 300, 64), dtype=jnp.bfloat16)
    o4 = jax.block_until_ready(positional_encoding_1d(t4))
    assert o4.dtype == jnp.bfloat16
    np.testing.assert_allclose(np.asarray(o4, dtype=np.float32),
                               _reference(t4, np.float64),
                               rtol=2e-2, atol=2e-2)

    print("KERNEL_OK")
</pallas_src>

<mosaic_0001>
module attributes {stable_mosaic.version = 11 : i64} {
  func.func @_penc_kernel(%arg0: i32, %arg1: memref<3x128xf32, #tpu.memory_space<vmem>>, %arg2: memref<1x128xf32, #tpu.memory_space<vmem>>) attributes {dimension_semantics = [#tpu.dimension_semantics<parallel>], iteration_bounds = array<i64: 1>, scalar_prefetch = 0 : i64, scratch_operands = 0 : i64, tpu.core_type = #tpu.core_type<tc>, window_params = [{pipeline_mode = #tpu.pipeline_mode<synchronous>, transform_indices = @transform_0, window_bounds = array<i64: 3, 128>}, {transform_indices = @transform_1, window_bounds = array<i64: 1, 128>}]} {
    %c1_i32 = arith.constant 1 : i32
    %0 = arith.muli %arg0, %c1_i32 : i32
    %1 = arith.sitofp %0 : i32 to f32
    %2 = tpu.iota {dimensions = array<i32: 0>} : vector<1x128xi32>
    %3 = arith.sitofp %2 : vector<1x128xi32> to vector<1x128xf32>
    %4 = vector.broadcast %1 : f32 to vector<1x128xf32>
    %5 = arith.addf %4, %3 : vector<1x128xf32>
    %cst = arith.constant 3.200000e+01 : f32
    %6 = vector.broadcast %cst : f32 to vector<1x128xf32>
    %7 = arith.mulf %5, %6 : vector<1x128xf32>
    %c0 = arith.constant 0 : index
    %c0_0 = arith.constant 0 : index
    %8 = vector.load %arg1[%c0, %c0_0] : memref<3x128xf32, #tpu.memory_space<vmem>>, vector<1x128xf32>
    %9 = arith.addf %7, %8 : vector<1x128xf32>
    %c1 = arith.constant 1 : index
    %c0_1 = arith.constant 0 : index
    %10 = vector.load %arg1[%c1, %c0_1] : memref<3x128xf32, #tpu.memory_space<vmem>>, vector<1x128xf32>
    %11 = arith.mulf %9, %10 : vector<1x128xf32>
    %c2 = arith.constant 2 : index
    %c0_2 = arith.constant 0 : index
    %12 = vector.load %arg1[%c2, %c0_2] : memref<3x128xf32, #tpu.memory_space<vmem>>, vector<1x128xf32>
    %13 = arith.addf %11, %12 : vector<1x128xf32>
    %14 = math.sin %13 : vector<1x128xf32>
    %c0_3 = arith.constant 0 : index
    %c0_4 = arith.constant 0 : index
    %15 = vector.load %arg2[%c0_3, %c0_4] : memref<1x128xf32, #tpu.memory_space<vmem>>, vector<1x128xf32>
    tpu.vector_store %arg2[%c0_3, %c0_4], %14 {strides = array<i32>} : memref<1x128xf32, #tpu.memory_space<vmem>>, vector<1x128xf32>,
    return
  }
  func.func @transform_0(%arg0: i32) -> (i32, i32) {
    %c0_i32 = arith.constant 0 : i32
    %c0_i32_0 = arith.constant 0 : i32
    %c0_i32_1 = arith.constant 0 : i32
    return %c0_i32, %c0_i32_0 : i32, i32
  }
  func.func @transform_1(%arg0: i32) -> (i32, i32) {
    %c0_i32 = arith.constant 0 : i32
    %c0_i32_0 = arith.constant 0 : i32
    return %arg0, %c0_i32 : i32, i32
  }
}

</mosaic_0001>

<bundles_post_ra>
// kernel: tpu_custom_call.1
= control target key start
LH: loop header
LB: loop body
LE: loop exit
PB: predicated region body
PF: predicated region fallthrough
CT: control target
= control target key end

     0   :  { %6 = vsyncpa [#allocation3], 0  ;;  %s285_s0 = inlined_call_operand.hbm [shape: f32[3,128], index: 0, kind: input, shape index: {}]   ;;  %s286_s1 = inlined_call_operand.hbm [shape: f32[1,128], index: 1, kind: output, shape index: {}]  }
   0x1   :  { %7 = vsyncpa [#allocation4], 0  ;;  %s222_s6 = smov [#allocation2]   ;;  %s174_s10 = scalar_lea.hbm %s285_s0, 64 }
   0x2   :  { %s14_s7 = sshll.u32 %s222_s6, 4  ;;  %p175_p0 = scmp.ne.s32.totalorder %s285_s0, %s174_s10  ;;  %s15_s7 = int_to_ptr.vmem [resolvable:$true] %s14_s7 }
   0x3   :  { %p178_p1 = scmp.lt.u32.totalorder %s174_s10, %s285_s0 }
   0x5   :  { %p180_p2 = pnand %p178_p1, %p175_p0 }
   0x7   :  { %183 = shalt.err (!%p180_p2)
}
   0x8   :  { %s184_s15 = scalar_lea.vmem %s15_s7, 64  ;;  %p189_p4 = scmp.lt.s32.totalorder %s15_s7, %s15_s7 }
   0x9   :  { %p185_p3 = scmp.ne.s32.totalorder %s15_s7, %s184_s15  ;;  %p190_p5 = scmp.lt.s32.totalorder %s184_s15, %s184_s15 }
   0xb   :  { %p191_p6 = por %p190_p5, %p189_p4 }
   0xd   :  { %p192_p7 = pnand %p191_p6, %p185_p3 }
   0xf   :  { %195 = shalt.err (!%p192_p7)
}
  0x10   :  { %17 = dma.hbm_to_vmem [thread:$0]  %s285_s0, 64, %s15_s7, [#allocation3]  }
  0x11   :  { %218 = dma.done.wait [#allocation3], 64  }
  0x12   :  { %219 = vsyncadd [#allocation3], 4294967232  ;;  %v22_v0 = vlaneseq  ;;  %v28_v4 = vld [vmem:[#allocation2] sm:$0x1]  ;;  %v30_v5 = vld [vmem:[#allocation2 + $0x1] sm:$0x1] }
  0x13   :  { %v32_v7 = vld [vmem:[#allocation2 + $0x2] sm:$0x1]  ;;  %v223_v21 = vmov 683565275   ;;  %v224_v23 = vmov 2475754826  }
  0x14   :  { %v23_v1 = vshrl.u32 %v22_v0, 7  ;;  %v225_v25 = vmov 2131351028   ;;  %v226_v27 = vmov 2102212464   ;;  %s229_s0 = smov [#allocation5]  }
  0x15   :  { %v227_v29 = vmov 920167782   ;;  %v228_v36 = vmov 1326507024   ;;  %s145_s18 = sshll.u32 %s229_s0, 4  ;;  %s146_s18 = int_to_ptr.vmem [resolvable:$true] %s145_s18 }
  0x16   :  { %v24_v2 = vcvt.s32.f32 %v23_v1  ;;  %s196_s19 = scalar_lea.vmem %s146_s18, 16  ;;  %s200_s20 = scalar_lea.vmem %s146_s18, 32 }
  0x17   :  { %p197_p8 = scmp.ne.s32.totalorder %s146_s18, %s196_s19  ;;  %p201_p9 = scmp.lt.s32.totalorder %s146_s18, %s146_s18 }
  0x18   :  { %v27_v3 = vmul.f32 32.0, %v24_v2  ;;  %p202_p10 = scmp.lt.s32.totalorder %s200_s20, %s196_s19 }
  0x1a   :  { %v29_v6 = vadd.f32 %v28_v4, %v27_v3  ;;  %p203_p11 = por %p202_p10, %p201_p9 }
  0x1c   :  { %v31_v8 = vmul.f32 %v30_v5, %v29_v6  ;;  %p204_p12 = pnand %p203_p11, %p197_p8 }
  0x1e   :  { %v252_v9 = vadd.f32 %v32_v7, %v31_v8 }
  0x20   :  { %v37_v10 = vand.u32 2139095040, %v252_v9  ;;  %v34_v12 = vand.u32 2147483647, %v252_v9  ;;  %vm36_vm7 = vcmp.lt.s32.totalorder %v252_v9, 0  ;;  %vm126_vm12 = vweird.f32 %v252_v9 }
  0x22   :  { %v38_v11 = vshrl.u32 %v37_v10, 23  ;;  %v41_v15 = vand.u32 8388607, %v34_v12  ;;  %vm35_vm8 = vcmp.le.f32.partialorder %v34_v12, 0.7853982 }
  0x24   :  { %v154_v13 = vadd.s32 4294967169, %v38_v11  ;;  %v42_v18 = vor.u32 8388608, %v41_v15 }
  0x26   :  { %v44_v14 = vadd.s32 1, %v154_v13  ;;  %v82_v38 = vshll.u32 %v42_v18, 8 }
  0x28   :  { %vm45_vm0 = vcmp.gt.s32.totalorder %v44_v14, 0 }
  0x29   :  { %v46_v16 = vsel %vm45_vm0, %v44_v14, 0 }
  0x2a   :  { %v48_v17 = vand.u32 31, %v46_v16  ;;  %v47_v19 = vshrl.u32 %v46_v16, 5 }
  0x2c   :  { %v49_v20 = vsub.s32 32, %v48_v17  ;;  %v51_v22 = vshll.u32 %v223_v21, %v48_v17  ;;  %v54_v24 = vshll.u32 %v224_v23, %v48_v17  ;;  %v57_v26 = vshll.u32 %v225_v25, %v48_v17 }
  0x2d   :  { %v60_v28 = vshll.u32 %v226_v27, %v48_v17  ;;  %v63_v30 = vshll.u32 %v227_v29, %v48_v17  ;;  %vm66_vm1 = vcmp.lt.s32.totalorder %v47_v19, 1  ;;  %vm69_vm2 = vcmp.lt.s32.totalorder %v47_v19, 4 }
  0x2e   :  { %v50_v31 = vshrl.u32 %v223_v21, %v49_v20  ;;  %v52_v32 = vshrl.u32 %v224_v23, %v49_v20  ;;  %v55_v33 = vshrl.u32 %v225_v25, %v49_v20  ;;  %v58_v34 = vshrl.u32 %v226_v27, %v49_v20 }
  0x2f   :  { %v61_v35 = vshrl.u32 %v227_v29, %v49_v20  ;;  %v64_v37 = vshrl.u32 %v228_v36, %v49_v20  ;;  %vm67_vm3 = vcmp.lt.s32.totalorder %v47_v19, 2  ;;  %vm68_vm4 = vcmp.lt.s32.totalorder %v47_v19, 3 }
  0x30   :  { %v53_v39 = vor.u32 %v52_v32, %v51_v22  ;;  %v56_v40 = vor.u32 %v55_v33, %v54_v24  ;;  %v59_v41 = vor.u32 %v58_v34, %v57_v26 }
  0x31   :  { %v62_v42 = vor.u32 %v61_v35, %v60_v28  ;;  %v65_v43 = vor.u32 %v64_v37, %v63_v30 }
  0x32   :  { %v70_v44 = vsel %vm66_vm1, %v50_v31, %v53_v39  ;;  %v71_v45 = vsel %vm69_vm2, %v59_v41, 2102212464  ;;  %v74_v46 = vsel %vm66_vm1, %v53_v39, %v56_v40  ;;  %v78_v47 = vsel %vm66_vm1, %v56_v40, %v59_v41 }
  0x33   :  { %v72_v48 = vsel %vm68_vm4, %v56_v40, %v71_v45  ;;  %v75_v49 = vsel %vm69_vm2, %v62_v42, 920167782  ;;  %v79_v50 = vsel %vm69_vm2, %v65_v43, 1326507024 }
  0x34   :  { %v76_v51 = vsel %vm68_vm4, %v59_v41, %v75_v49  ;;  %v80_v52 = vsel %vm68_vm4, %v62_v42, %v79_v50  ;;  %v73_v53 = vsel %vm67_vm3, %v70_v44, %v72_v48 }
  0x35   :  { %v77_v54 = vsel %vm67_vm3, %v74_v46, %v76_v51  ;;  %v81_v55 = vsel %vm67_vm3, %v78_v47, %v80_v52  ;;  %v89_v60 = vmul.u32 %v82_v38, %v73_v53 }
  0x36   :  { %v258_v56 = vmul.u32.u64.low %v82_v38, %v81_v55  ;;  %v259_v57 = vmul.u32.u64.high %v82_v38, %v81_v55, %v258_v56  ;;  %v261_v58 = vmul.u32.u64.low %v82_v38, %v77_v54  ;;  %v262_v59 = vmul.u32.u64.high %v82_v38, %v77_v54, %v261_v58 }
  0x38   :  { %vm91_vm5 = vc.u32 %v259_v57, %v261_v58  ;;  %v92_v61 = vadd.s32 1, %v262_v59  ;;  %v90_v8 = vadd.s32 %v261_v58, %v259_v57 }
  0x3a   :  { %v93_v62 = vsel %vm91_vm5, %v92_v61, %v262_v59 }
  0x3b   :  { %v94_v63 = vadd.s32 %v93_v62, %v89_v60 }
  0x3d   :  { %v95_v0 = vadd.s32 536870912, %v94_v63 }
  0x3f   :  { %v96_v1 = vshrl.u32 %v95_v0, 30 }
  0x41   :  { %v97_v2 = vshll.u32 %v96_v1, 30  ;;  %v120_v22 = vsub.s32 4, %v96_v1 }
  0x43   :  { %v98_v3 = vsub.s32 %v94_v63, %v97_v2  ;;  %v121_v25 = vsel %vm36_vm7, %v120_v22, %v96_v1 }
  0x44   :  { %v123_v28 = vsel %vm35_vm8, 0, %v121_v25 }
  0x45   :  { %v100_v4 = vsub.s32 0, %v98_v3  ;;  %v127_v29 = vadd.s32 3, %v123_v28 }
  0x47   :  { %v155_v5 = vmin.u32 %v100_v4, %v98_v3  ;;  %v128_v30 = vand.u32 3, %v127_v29 }
  0x49   :  { %v102_v6 = vclz %v155_v5  ;;  %vm133_vm9 = vcmp.eq.s32.totalorder %v128_v30, 2  ;;  %vm130_vm10 = vcmp.eq.s32.totalorder %v128_v30, 0  ;;  %vm129_vm11 = vcmp.lt.s32.totalorder %v128_v30, 2 }
  0x4b   :  { %v156_v7 = vadd.s32 4294967294, %v102_v6 }
  0x4d   :  { %vm157_vm6 = vcmp.lt.s32.totalorder %v156_v7, 0 }
  0x4e   :  { %v105_v10 = vsel %vm157_vm6, 0, %v156_v7 }
  0x4f   :  { %v106_v11 = vsub.s32 32, %v105_v10  ;;  %v107_v13 = vshll.u32 %v98_v3, %v105_v10  ;;  %v110_v14 = vsub.s32 4294967266, %v105_v10 }
  0x51   :  { %v108_v15 = vshrl.u32 %v90_v8, %v106_v11  ;;  %v111_v16 = vadd.s32 127, %v110_v14 }
  0x53   :  { %v109_v17 = vor.u32 %v108_v15, %v107_v13  ;;  %v112_v18 = vshll.u32 %v111_v16, 23 }
  0x55   :  { %v113_v19 = vor.u32 4788187, %v112_v18  ;;  %v116_v20 = vcvt.s32.f32 %v109_v17 }
  0x57   :  { %v114_v21 = vand.u32 2147483647, %v113_v19 }
  0x59   :  { %v117_v23 = vmul.f32 %v116_v20, %v114_v21 }
  0x5b   :  { %v118_v24 = vxor.u32 2147483648, %v117_v23 }
  0x5d   :  { %v119_v26 = vsel %vm36_vm7, %v118_v24, %v117_v23 }
  0x5e   :  { %v122_v27 = vsel %vm35_vm8, %v252_v9, %v119_v26 }
  0x5f   :  { %170 = vcosq.f32 %v122_v27 }
  0x60   :  { %172 = vsinq.f32 %v122_v27 }
  0x69   :  { %v171_v31 = vpop.eup %170 }
  0x6a   :  { %v173_v32 = vpop.eup %172  ;;  %v134_v33 = vxor.u32 2147483648, %v171_v31 }
  0x6b   :  { %v131_v34 = vxor.u32 2147483648, %v173_v32 }
  0x6c   :  { %v135_v12 = vsel %vm133_vm9, %v134_v33, %v173_v32 }
  0x6d   :  { %v132_v35 = vsel %vm130_vm10, %v171_v31, %v131_v34 }
  0x6e   :  { %v136_v36 = vsel %vm129_vm11, %v132_v35, %v135_v12 }
  0x6f   :  { %v137_v37 = vsel %vm126_vm12, nan, %v136_v36 }
  0x70   :  { %138 = vst [vmem:[#allocation5] sm:$0x1] %v137_v37 }
  0x71   :  { %207 = shalt.err (!%p204_p12)
}
  0x72   :  { %s208_s23 = scalar_lea.hbm %s286_s1, 16 }
  0x73   :  { %p209_p13 = scmp.ne.s32.totalorder %s286_s1, %s208_s23  ;;  %p212_p0 = scmp.lt.u32.totalorder %s208_s23, %s286_s1 }
  0x75   :  { %p214_p1 = pnand %p212_p0, %p209_p13 }
  0x77   :  { %217 = shalt.err (!%p214_p1)
}
  0x78   :  { %148 = dma.vmem_to_hbm [thread:$0]  %s146_s18, 16, %s286_s1, [#allocation4]  }
  0x79   :  { %220 = dma.done.wait [#allocation4], 16  }
  0x7a   :  { %221 = vsyncadd [#allocation4], 4294967280 }
  0x7b   :  { %152 = vsyncpa [#allocation3], 1 }
  0x7c   :  { %153 = vsyncpa [#allocation4], 1 }

</bundles_post_ra>
